<compile_context>
chip_gen: v6e
topology: v6e:2x2x1
jax: 0.10.0
libtpu: 0.0.40
codegen_flags: <defaults>
</compile_context>

<pallas_src>
import functools

import jax
import jax.numpy as jnp
from jax.experimental import pallas as pl
from jax.experimental.pallas import tpu as pltpu


def rnn_kernel(x_ref, w_ref, out_ref, *,
               seq_len, batch, ep, hp, op,
               r_wih, r_whh, r_wfc, r_b, r_bfc):
    # ---- Static row slices of the single packed weight buffer (free) -------
    wih   = w_ref[r_wih:r_wih + ep, :hp]     # (Ep, Hp)  = W_ih^T, zero-padded
    whh   = w_ref[r_whh:r_whh + hp, :hp]     # (Hp, Hp)  = W_hh^T, loop-invariant
    wfc   = w_ref[r_wfc:r_wfc + hp, :op]     # (Hp, Op)  = W_fc^T
    b_rnn = w_ref[r_b:r_b + 1, :hp]          # (1, Hp)   = b_ih + b_hh
    b_fc  = w_ref[r_bfc:r_bfc + 1, :op]      # (1, Op)

    # ---- Input projection for the whole sequence in one MXU matmul ---------
    # Result stays in vregs (no VMEM scratch, no store->load on the chain).
    xh = jnp.dot(x_ref[...], wih, preferred_element_type=jnp.float32) + b_rnn

    # ---- Serial recurrence: h_t = tanh(xh_t + h_{t-1} @ W_hh^T) ------------
    # Fully unrolled at trace time; slices are static and sublane-aligned
    # (batch is a multiple of 8 here).
    h = jnp.zeros((batch, hp), jnp.float32)
    for t in range(seq_len):
        xh_t = xh[t * batch:(t + 1) * batch, :]
        h = jnp.tanh(xh_t + jnp.dot(h, whh, preferred_element_type=jnp.float32))

    # ---- Fused fc(hidden.squeeze(0)) ----------------------------------------
    out_ref[...] = (jnp.dot(h, wfc, preferred_element_type=jnp.float32)
                    + b_fc).astype(out_ref.dtype)


def prepare_params(emb_table, w_ih, w_hh, b_ih, b_hh, w_fc, b_fc):
    """One-time weight preprocessing (run once, cache the results)."""
    lane = 128
    E = emb_table.shape[1]
    H = w_hh.shape[0]
    O = w_fc.shape[0]
    Ep = -(-E // lane) * lane
    Hp = -(-H // lane) * lane
    Op = -(-O // lane) * lane
    Wc = max(Hp, Op)

    # Row layout of the single packed buffer (all segments 8-row aligned).
    r_wih = 0
    r_whh = Ep
    r_wfc = Ep + Hp
    r_b   = Ep + 2 * Hp
    r_bfc = r_b + 8
    n_rows = r_bfc + 8

    # Padded rows/cols are zero, so padded hidden/output lanes stay exactly 0
    # through tanh (tanh(0) == 0) and the fc, and are sliced off at the end.
    packed = jnp.zeros((n_rows, Wc), jnp.float32)
    packed = packed.at[r_wih:r_wih + E, :H].set(jnp.transpose(w_ih).astype(jnp.float32))
    packed = packed.at[r_whh:r_whh + H, :H].set(jnp.transpose(w_hh).astype(jnp.float32))
    packed = packed.at[r_wfc:r_wfc + H, :O].set(jnp.transpose(w_fc).astype(jnp.float32))
    packed = packed.at[r_b, :H].set((b_ih + b_hh).astype(jnp.float32))
    packed = packed.at[r_bfc, :O].set(b_fc.astype(jnp.float32))

    # Pad the embedding feature dim once so the per-call gather already
    # produces a lane-dense (S*B, Ep) block (no per-call pad op).
    emb_p = jnp.zeros((emb_table.shape[0], Ep), jnp.float32)
    emb_p = emb_p.at[:, :E].set(emb_table.astype(jnp.float32))

    meta = dict(E=E, H=H, O=O, Ep=Ep, Hp=Hp, Op=Op,
                r_wih=r_wih, r_whh=r_whh, r_wfc=r_wfc, r_b=r_b, r_bfc=r_bfc)
    return emb_p, packed, meta


def make_rnn_forward(meta):
    """Returns a jitted forward: (text, emb_p, packed) -> (B, output_dim)."""

    @jax.jit
    def forward(text, emb_p, packed):
        S, B = text.shape
        # Embedding lookup is glue (gather) — plain JAX; already lane-dense.
        x2 = emb_p[text].reshape(S * B, meta["Ep"])

        kernel = functools.partial(
            rnn_kernel, seq_len=S, batch=B,
            ep=meta["Ep"], hp=meta["Hp"], op=meta["Op"],
            r_wih=meta["r_wih"], r_whh=meta["r_whh"], r_wfc=meta["r_wfc"],
            r_b=meta["r_b"], r_bfc=meta["r_bfc"])

        vmem = pl.BlockSpec(memory_space=pltpu.MemorySpace.VMEM)
        out = pl.pallas_call(
            kernel,
            out_shape=jax.ShapeDtypeStruct((B, meta["Op"]), jnp.float32),
            in_specs=[vmem, vmem],          # x block + ONE packed weight DMA
            out_specs=vmem,
        )(x2, packed)
        return out[:, :meta["O"]]

    return forward


def reference_forward(text, emb_table, w_ih, w_hh, b_ih, b_hh, w_fc, b_fc):
    embedded = emb_table[text]                       # (S, B, E)
    B = text.shape[1]
    H = w_hh.shape[0]
    h = jnp.zeros((B, H), jnp.float32)
    for t in range(text.shape[0]):
        h = jnp.tanh(embedded[t] @ w_ih.T + b_ih + h @ w_hh.T + b_hh)
    return h @ w_fc.T + b_fc


if __name__ == "__main__":
    # Small, forward-implied shapes.
    input_dim = 50      # vocab size
    embedding_dim = 32
    hidden_dim = 32
    output_dim = 16
    seq_len = 8
    batch = 8

    key = jax.random.PRNGKey(0)
    k_txt, k_emb, k_wih, k_whh, k_bih, k_bhh, k_wfc, k_bfc = jax.random.split(key, 8)

    text = jax.random.randint(k_txt, (seq_len, batch), 0, input_dim, dtype=jnp.int32)

    # Deterministic parameter init (synthetic; not a checkpoint load).
    emb_table = jax.random.normal(k_emb, (input_dim, embedding_dim), jnp.float32) * 0.1
    w_ih = jax.random.normal(k_wih, (hidden_dim, embedding_dim), jnp.float32) * 0.1
    w_hh = jax.random.normal(k_whh, (hidden_dim, hidden_dim), jnp.float32) * 0.1
    b_ih = jax.random.normal(k_bih, (hidden_dim,), jnp.float32) * 0.1
    b_hh = jax.random.normal(k_bhh, (hidden_dim,), jnp.float32) * 0.1
    w_fc = jax.random.normal(k_wfc, (output_dim, hidden_dim), jnp.float32) * 0.1
    b_fc = jax.random.normal(k_bfc, (output_dim,), jnp.float32) * 0.1

    # One-time preprocessing (cached across calls).
    emb_p, packed, meta = prepare_params(emb_table, w_ih, w_hh, b_ih, b_hh, w_fc, b_fc)
    emb_p, packed = jax.block_until_ready((emb_p, packed))

    forward = make_rnn_forward(meta)
    out = jax.block_until_ready(forward(text, emb_p, packed))

    ref = reference_forward(text, emb_table, w_ih, w_hh, b_ih, b_hh, w_fc, b_fc)
    assert out.shape == (batch, output_dim)
    assert jnp.allclose(out, ref, atol=1e-5, rtol=1e-5), "mismatch vs reference"

    print("KERNEL_OK")
</pallas_src>

<mosaic_0001>
module attributes {stable_mosaic.version = 11 : i64} {
  func.func @rnn_kernel(%arg0: memref<64x128xf32, #tpu.memory_space<vmem>>, %arg1: memref<400x128xf32, #tpu.memory_space<vmem>>, %arg2: memref<8x128xf32, #tpu.memory_space<vmem>>) attributes {dimension_semantics = [], scalar_prefetch = 0 : i64, scratch_operands = 0 : i64, tpu.core_type = #tpu.core_type<tc>} {
    %c0 = arith.constant 0 : index
    %c0_0 = arith.constant 0 : index
    %0 = vector.load %arg1[%c0, %c0_0] : memref<400x128xf32, #tpu.memory_space<vmem>>, vector<128x128xf32>
    %c128 = arith.constant 128 : index
    %c0_1 = arith.constant 0 : index
    %1 = vector.load %arg1[%c128, %c0_1] : memref<400x128xf32, #tpu.memory_space<vmem>>, vector<128x128xf32>
    %c256 = arith.constant 256 : index
    %c0_2 = arith.constant 0 : index
    %2 = vector.load %arg1[%c256, %c0_2] : memref<400x128xf32, #tpu.memory_space<vmem>>, vector<128x128xf32>
    %c384 = arith.constant 384 : index
    %c0_3 = arith.constant 0 : index
    %3 = vector.load %arg1[%c384, %c0_3] : memref<400x128xf32, #tpu.memory_space<vmem>>, vector<1x128xf32>
    %c392 = arith.constant 392 : index
    %c0_4 = arith.constant 0 : index
    %4 = vector.load %arg1[%c392, %c0_4] : memref<400x128xf32, #tpu.memory_space<vmem>>, vector<1x128xf32>
    %c0_5 = arith.constant 0 : index
    %c0_6 = arith.constant 0 : index
    %5 = vector.load %arg0[%c0_5, %c0_6] : memref<64x128xf32, #tpu.memory_space<vmem>>, vector<64x128xf32>
    %cst = arith.constant dense<0.000000e+00> : vector<64x128xf32>
    %6 = tpu.matmul %5, %0, %cst {dimension_numbers = #tpu.dot_dimension_numbers<[1], [0], [0], [1], [0, 0, 1, 1], [], []>} : vector<64x128xf32>, vector<128x128xf32>, vector<64x128xf32> -> vector<64x128xf32>
    %7 = vector.broadcast %3 : vector<1x128xf32> to vector<64x128xf32>
    %8 = arith.addf %6, %7 : vector<64x128xf32>
    %cst_7 = arith.constant 0.000000e+00 : f32
    %9 = vector.broadcast %cst_7 : f32 to vector<8x128xf32>
    %10 = vector.extract_strided_slice %8 {offsets = [0, 0], sizes = [8, 128], strides = [1, 1]} : vector<64x128xf32> to vector<8x128xf32>
    %cst_8 = arith.constant dense<0.000000e+00> : vector<8x128xf32>
    %11 = tpu.matmul %9, %1, %cst_8 {dimension_numbers = #tpu.dot_dimension_numbers<[1], [0], [0], [1], [0, 0, 1, 1], [], []>} : vector<8x128xf32>, vector<128x128xf32>, vector<8x128xf32> -> vector<8x128xf32>
    %12 = arith.addf %10, %11 : vector<8x128xf32>
    %13 = math.tanh %12 : vector<8x128xf32>
    %14 = vector.extract_strided_slice %8 {offsets = [8, 0], sizes = [8, 128], strides = [1, 1]} : vector<64x128xf32> to vector<8x128xf32>
    %cst_9 = arith.constant dense<0.000000e+00> : vector<8x128xf32>
    %15 = tpu.matmul %13, %1, %cst_9 {dimension_numbers = #tpu.dot_dimension_numbers<[1], [0], [0], [1], [0, 0, 1, 1], [], []>} : vector<8x128xf32>, vector<128x128xf32>, vector<8x128xf32> -> vector<8x128xf32>
    %16 = arith.addf %14, %15 : vector<8x128xf32>
    %17 = math.tanh %16 : vector<8x128xf32>
    %18 = vector.extract_strided_slice %8 {offsets = [16, 0], sizes = [8, 128], strides = [1, 1]} : vector<64x128xf32> to vector<8x128xf32>
    %cst_10 = arith.constant dense<0.000000e+00> : vector<8x128xf32>
    %19 = tpu.matmul %17, %1, %cst_10 {dimension_numbers = #tpu.dot_dimension_numbers<[1], [0], [0], [1], [0, 0, 1, 1], [], []>} : vector<8x128xf32>, vector<128x128xf32>, vector<8x128xf32> -> vector<8x128xf32>
    %20 = arith.addf %18, %19 : vector<8x128xf32>
    %21 = math.tanh %20 : vector<8x128xf32>
    %22 = vector.extract_strided_slice %8 {offsets = [24, 0], sizes = [8, 128], strides = [1, 1]} : vector<64x128xf32> to vector<8x128xf32>
    %cst_11 = arith.constant dense<0.000000e+00> : vector<8x128xf32>
    %23 = tpu.matmul %21, %1, %cst_11 {dimension_numbers = #tpu.dot_dimension_numbers<[1], [0], [0], [1], [0, 0, 1, 1], [], []>} : vector<8x128xf32>, vector<128x128xf32>, vector<8x128xf32> -> vector<8x128xf32>
    %24 = arith.addf %22, %23 : vector<8x128xf32>
    %25 = math.tanh %24 : vector<8x128xf32>
    %26 = vector.extract_strided_slice %8 {offsets = [32, 0], sizes = [8, 128], strides = [1, 1]} : vector<64x128xf32> to vector<8x128xf32>
    %cst_12 = arith.constant dense<0.000000e+00> : vector<8x128xf32>
    %27 = tpu.matmul %25, %1, %cst_12 {dimension_numbers = #tpu.dot_dimension_numbers<[1], [0], [0], [1], [0, 0, 1, 1], [], []>} : vector<8x128xf32>, vector<128x128xf32>, vector<8x128xf32> -> vector<8x128xf32>
    %28 = arith.addf %26, %27 : vector<8x128xf32>
    %29 = math.tanh %28 : vector<8x128xf32>
    %30 = vector.extract_strided_slice %8 {offsets = [40, 0], sizes = [8, 128], strides = [1, 1]} : vector<64x128xf32> to vector<8x128xf32>
    %cst_13 = arith.constant dense<0.000000e+00> : vector<8x128xf32>
    %31 = tpu.matmul %29, %1, %cst_13 {dimension_numbers = #tpu.dot_dimension_numbers<[1], [0], [0], [1], [0, 0, 1, 1], [], []>} : vector<8x128xf32>, vector<128x128xf32>, vector<8x128xf32> -> vector<8x128xf32>
    %32 = arith.addf %30, %31 : vector<8x128xf32>
    %33 = math.tanh %32 : vector<8x128xf32>
    %34 = vector.extract_strided_slice %8 {offsets = [48, 0], sizes = [8, 128], strides = [1, 1]} : vector<64x128xf32> to vector<8x128xf32>
    %cst_14 = arith.constant dense<0.000000e+00> : vector<8x128xf32>
    %35 = tpu.matmul %33, %1, %cst_14 {dimension_numbers = #tpu.dot_dimension_numbers<[1], [0], [0], [1], [0, 0, 1, 1], [], []>} : vector<8x128xf32>, vector<128x128xf32>, vector<8x128xf32> -> vector<8x128xf32>
    %36 = arith.addf %34, %35 : vector<8x128xf32>
    %37 = math.tanh %36 : vector<8x128xf32>
    %38 = vector.extract_strided_slice %8 {offsets = [56, 0], sizes = [8, 128], strides = [1, 1]} : vector<64x128xf32> to vector<8x128xf32>
    %cst_15 = arith.constant dense<0.000000e+00> : vector<8x128xf32>
    %39 = tpu.matmul %37, %1, %cst_15 {dimension_numbers = #tpu.dot_dimension_numbers<[1], [0], [0], [1], [0, 0, 1, 1], [], []>} : vector<8x128xf32>, vector<128x128xf32>, vector<8x128xf32> -> vector<8x128xf32>
    %40 = arith.addf %38, %39 : vector<8x128xf32>
    %41 = math.tanh %40 : vector<8x128xf32>
    %cst_16 = arith.constant dense<0.000000e+00> : vector<8x128xf32>
    %42 = tpu.matmul %41, %2, %cst_16 {dimension_numbers = #tpu.dot_dimension_numbers<[1], [0], [0], [1], [0, 0, 1, 1], [], []>} : vector<8x128xf32>, vector<128x128xf32>, vector<8x128xf32> -> vector<8x128xf32>
    %43 = vector.broadcast %4 : vector<1x128xf32> to vector<8x128xf32>
    %44 = arith.addf %42, %43 : vector<8x128xf32>
    %c0_17 = arith.constant 0 : index
    %c0_18 = arith.constant 0 : index
    %45 = vector.load %arg2[%c0_17, %c0_18] : memref<8x128xf32, #tpu.memory_space<vmem>>, vector<8x128xf32>
    tpu.vector_store %arg2[%c0_17, %c0_18], %44 {strides = array<i32>} : memref<8x128xf32, #tpu.memory_space<vmem>>, vector<8x128xf32>,
    return
  }
}

</mosaic_0001>

<bundles_post_ra>
// kernel: forward.1
= control target key start
LH: loop header
LB: loop body
LE: loop exit
PB: predicated region body
PF: predicated region fallthrough
CT: control target
= control target key end

     0   :  { %v1423_v3 = vmov 0.0   ;;  %s1966_s0 = inlined_call_operand.vmem [shape: f32[64,128], index: 0, kind: input, shape index: {}]   ;;  %s1967_s1 = inlined_call_operand.vmem [shape: f32[400,128], index: 1, kind: input, shape index: {}]   ;;  %s1968_s2 = inlined_call_operand.hbm [shape: f32[8,128], index: 2, kind: output, shape index: {}]  }
   0x1   :  { %v27_v0 = vld [vmem:[%s1967_s1 + $0x78] sm:$0xff]  ;;  %v26_v1 = vld [vmem:[%s1967_s1 + $0x70] sm:$0xff]  ;;  %1067 = vmatprep.subr.mxu1 %v1423_v3  ;;  %v25_v5 = vld [vmem:[%s1967_s1 + $0x68] sm:$0xff] }
   0x2   :  { %v1450_v2 = vld [vmem:[%s1967_s1 + $0xf8] sm:$0xff]  ;;  %1023 = vmatprep.subr.mxu0 %v27_v0  ;;  %v1456_v4 = vld [vmem:[%s1967_s1 + $0xf0] sm:$0xff]  ;;  %v1466_v6 = vld [vmem:[%s1967_s1 + $0xe8] sm:$0xff] }
   0x3   :  { %1024 = vmatpush3.msra.mxu0 %v27_v0  ;;  %1068 = vmatpush3.msra.mxu1 %v1450_v2  ;;  %v24_v7 = vld [vmem:[%s1967_s1 + $0x60] sm:$0xff]  ;;  %v23_v9 = vld [vmem:[%s1967_s1 + $0x58] sm:$0xff]  ;;  %v22_v11 = vld [vmem:[%s1967_s1 + $0x50] sm:$0xff] }
   0x4   :  { %1025 = vmatprep.subr.mxu0 %v26_v1  ;;  %1069 = vmatprep.subr.mxu1 %v1423_v3  ;;  %v1476_v8 = vld [vmem:[%s1967_s1 + $0xe0] sm:$0xff]  ;;  %v1486_v10 = vld [vmem:[%s1967_s1 + $0xd8] sm:$0xff]  ;;  %v1496_v12 = vld [vmem:[%s1967_s1 + $0xd0] sm:$0xff] }
   0x5   :  { %1026 = vmatpush3.msra.mxu0 %v26_v1  ;;  %1070 = vmatpush3.msra.mxu1 %v1456_v4  ;;  %v21_v13 = vld [vmem:[%s1967_s1 + $0x48] sm:$0xff] }
   0x6   :  { %1027 = vmatprep.subr.mxu0 %v25_v5  ;;  %1071 = vmatprep.subr.mxu1 %v1423_v3  ;;  %v1506_v14 = vld [vmem:[%s1967_s1 + $0xc8] sm:$0xff] }
   0x7   :  { %1028 = vmatpush3.msra.mxu0 %v25_v5  ;;  %1072 = vmatpush3.msra.mxu1 %v1466_v6 }
   0x8   :  { %1029 = vmatprep.subr.mxu0 %v24_v7  ;;  %1073 = vmatprep.subr.mxu1 %v1423_v3 }
   0x9   :  { %1030 = vmatpush3.msra.mxu0 %v24_v7  ;;  %1074 = vmatpush3.msra.mxu1 %v1476_v8 }
   0xa   :  { %1031 = vmatprep.subr.mxu0 %v23_v9  ;;  %1075 = vmatprep.subr.mxu1 %v1423_v3 }
   0xb   :  { %1032 = vmatpush3.msra.mxu0 %v23_v9  ;;  %1076 = vmatpush3.msra.mxu1 %v1486_v10 }
   0xc   :  { %1033 = vmatprep.subr.mxu0 %v22_v11  ;;  %1077 = vmatprep.subr.mxu1 %v1423_v3 }
   0xd   :  { %7 = vsyncpa [#allocation3], 0  ;;  %1034 = vmatpush3.msra.mxu0 %v22_v11  ;;  %1078 = vmatpush3.msra.mxu1 %v1496_v12  ;;  %v20_v15 = vld [vmem:[%s1967_s1 + $0x40] sm:$0xff]  ;;  %v19_v17 = vld [vmem:[%s1967_s1 + $0x38] sm:$0xff]  ;;  %vm1424_vm0 = vmmov 0   ;;  %s1425_s11 = smov [#allocation2]  }
   0xe   :  { %1035 = vmatprep.subr.mxu0 %v21_v13  ;;  %1079 = vmatprep.subr.mxu1 %v1423_v3  ;;  %v1516_v16 = vld [vmem:[%s1967_s1 + $0xc0] sm:$0xff]  ;;  %v1526_v18 = vld [vmem:[%s1967_s1 + $0xb8] sm:$0xff]  ;;  %v18_v19 = vld [vmem:[%s1967_s1 + $0x30] sm:$0xff]  ;;  %s836_s12 = sshll.u32 %s1425_s11, 4  ;;  %s837_s12 = int_to_ptr.vmem [resolvable:$true] %s836_s12 }
   0xf   :  { %1036 = vmatpush3.msra.mxu0 %v21_v13  ;;  %1080 = vmatpush3.msra.mxu1 %v1506_v14  ;;  %v1536_v20 = vld [vmem:[%s1967_s1 + $0xb0] sm:$0xff]  ;;  %v17_v21 = vld [vmem:[%s1967_s1 + $0x28] sm:$0xff]  ;;  %v16_v23 = vld [vmem:[%s1967_s1 + $0x20] sm:$0xff]  ;;  %s1401_s13 = scalar_lea.vmem %s837_s12, 128  ;;  %p1406_p1 = scmp.lt.s32.totalorder %s837_s12, %s837_s12 }
  0x10   :  { %1037 = vmatprep.subr.mxu0 %v20_v15  ;;  %1081 = vmatprep.subr.mxu1 %v1423_v3  ;;  %v1546_v22 = vld [vmem:[%s1967_s1 + $0xa8] sm:$0xff]  ;;  %v1556_v24 = vld [vmem:[%s1967_s1 + $0xa0] sm:$0xff]  ;;  %v15_v25 = vld [vmem:[%s1967_s1 + $0x18] sm:$0xff]  ;;  %p1402_p0 = scmp.ne.s32.totalorder %s837_s12, %s1401_s13  ;;  %p1407_p2 = scmp.lt.s32.totalorder %s1401_s13, %s1401_s13 }
  0x11   :  { %1038 = vmatpush3.msra.mxu0 %v20_v15  ;;  %1082 = vmatpush3.msra.mxu1 %v1516_v16  ;;  %v1566_v26 = vld [vmem:[%s1967_s1 + $0x98] sm:$0xff]  ;;  %v14_v27 = vld [vmem:[%s1967_s1 + $0x10] sm:$0xff]  ;;  %v13_v29 = vld [vmem:[%s1967_s1 + $0x8] sm:$0xff] }
  0x12   :  { %1039 = vmatprep.subr.mxu0 %v19_v17  ;;  %1083 = vmatprep.subr.mxu1 %v1423_v3  ;;  %v1576_v28 = vld [vmem:[%s1967_s1 + $0x90] sm:$0xff]  ;;  %v62_v30 = vld [vmem:[%s1966_s0] sm:$0xff]  ;;  %v1593_v32 = vld [vmem:[%s1967_s1 + $0x88] sm:$0xff]  ;;  %p1408_p3 = por %p1407_p2, %p1406_p1 }
  0x13   :  { %1040 = vmatpush3.msra.mxu0 %v19_v17  ;;  %1084 = vmatpush3.msra.mxu1 %v1526_v18  ;;  %v12_v31 = vld [vmem:[%s1967_s1] sm:$0xff]  ;;  %v63_v33 = vld [vmem:[%s1966_s0 + $0x8] sm:$0xff]  ;;  %v64_v35 = vld [vmem:[%s1966_s0 + $0x10] sm:$0xff] }
  0x14   :  { %1041 = vmatprep.subr.mxu0 %v18_v19  ;;  %1085 = vmatprep.subr.mxu1 %v1423_v3  ;;  %v1602_v34 = vld [vmem:[%s1967_s1 + $0x80] sm:$0xff]  ;;  %v65_v36 = vld [vmem:[%s1966_s0 + $0x18] sm:$0xff]  ;;  %v67_v38 = vld [vmem:[%s1966_s0 + $0x28] sm:$0xff]  ;;  %p1409_p4 = pnand %p1408_p3, %p1402_p0 }
  0x15   :  { %1042 = vmatpush3.msra.mxu0 %v18_v19  ;;  %1086 = vmatpush3.msra.mxu1 %v1536_v20  ;;  %v66_v37 = vld [vmem:[%s1966_s0 + $0x20] sm:$0xff]  ;;  %v68_v39 = vld [vmem:[%s1966_s0 + $0x30] sm:$0xff]  ;;  %v69_v40 = vld [vmem:[%s1966_s0 + $0x38] sm:$0xff] }
  0x16   :  { %1043 = vmatprep.subr.mxu0 %v17_v21  ;;  %1087 = vmatprep.subr.mxu1 %v1423_v3  ;;  %v1701_v42 = vld [vmem:[%s1967_s1 + $0x180] ss:$0 sm:$0xff] }
  0x17   :  { %1044 = vmatpush3.msra.mxu0 %v17_v21  ;;  %1088 = vmatpush3.msra.mxu1 %v1546_v22 }
  0x18   :  { %1045 = vmatprep.subr.mxu0 %v16_v23  ;;  %1089 = vmatprep.subr.mxu1 %v1423_v3 }
  0x19   :  { %1046 = vmatpush3.msra.mxu0 %v16_v23  ;;  %1090 = vmatpush3.msra.mxu1 %v1556_v24  ;;  %v53_v23 = vld [vmem:[%s1967_s1 + $0x148] sm:$0xff] }
  0x1a   :  { %1047 = vmatprep.subr.mxu0 %v15_v25  ;;  %1091 = vmatprep.subr.mxu1 %v1423_v3 }
  0x1b   :  { %1048 = vmatpush3.msra.mxu0 %v15_v25  ;;  %1092 = vmatpush3.msra.mxu1 %v1566_v26 }
  0x1c   :  { %1049 = vmatprep.subr.mxu0 %v14_v27  ;;  %1093 = vmatprep.subr.mxu1 %v1423_v3 }
  0x1d   :  { %1050 = vmatpush3.msra.mxu0 %v14_v27  ;;  %1094 = vmatpush3.msra.mxu1 %v1576_v28 }
  0x1e   :  { %1051 = vmatprep.subr.mxu0 %v13_v29  ;;  %1095 = vmatprep.subr.mxu1 %v1423_v3 }
  0x1f   :  { %1052 = vmatpush3.msra.mxu0 %v13_v29  ;;  %1055 = vmatprep.mubr.f32.mxu0 %v62_v30  ;;  %v52_v29 = vld [vmem:[%s1967_s1 + $0x140] sm:$0xff]  ;;  %v51_v30 = vld [vmem:[%s1967_s1 + $0x138] sm:$0xff] }
  0x20   :  { %1053 = vmatprep.subr.mxu0 %v12_v31  ;;  %1096 = vmatpush3.msra.mxu1 %v1593_v32 }
  0x21   :  { %1054 = vmatpush3.msra.mxu0 %v12_v31  ;;  %1097 = vmatprep.subr.mxu1 %v1423_v3  ;;  %v50_v31 = vld [vmem:[%s1967_s1 + $0x130] sm:$0xff] }
  0x22   :  { %1056 = vmatmul.mubr.f32.vlgmr.msra.gmra.mxu0 %v63_v33  ;;  %1098 = vmatpush3.msra.mxu1 %v1602_v34  ;;  %v48_v33 = vld [vmem:[%s1967_s1 + $0x120] sm:$0xff] }
  0x23   :  { %1099 = vmatprep.mubr.msk.f32.mxu1 %vm1424_vm0, %v1423_v3  ;;  %1102 = vmatprep.subr.mxu0 %v1423_v3 }
  0x24   :  { %1100 = vmatmul.mubr.f32.vlgmr.msra.gmra.mxu1 %v1423_v3  ;;  %1103 = vmatpush3.msra.mxu0 %v1450_v2 }
  0x25   :  { %1104 = vmatprep.subr.mxu0 %v1423_v3  ;;  %1137 = vmatprep.subr.mxu1 %v1423_v3 }
  0x26   :  { %1105 = vmatpush3.msra.mxu0 %v1456_v4  ;;  %1138 = vmatpush3.msra.mxu1 %v1450_v2 }
  0x27   :  { %1106 = vmatprep.subr.mxu0 %v1423_v3  ;;  %1139 = vmatprep.subr.mxu1 %v1423_v3 }
  0x28   :  { %1107 = vmatpush3.msra.mxu0 %v1466_v6  ;;  %1140 = vmatpush3.msra.mxu1 %v1456_v4 }
  0x29   :  { %1108 = vmatprep.subr.mxu0 %v1423_v3  ;;  %1141 = vmatprep.subr.mxu1 %v1423_v3 }
  0x2a   :  { %1109 = vmatpush3.msra.mxu0 %v1476_v8  ;;  %1142 = vmatpush3.msra.mxu1 %v1466_v6 }
  0x2b   :  { %1110 = vmatprep.subr.mxu0 %v1423_v3  ;;  %1143 = vmatprep.subr.mxu1 %v1423_v3 }
  0x2c   :  { %1111 = vmatpush3.msra.mxu0 %v1486_v10  ;;  %1144 = vmatpush3.msra.mxu1 %v1476_v8 }
  0x2d   :  { %1112 = vmatprep.subr.mxu0 %v1423_v3  ;;  %1145 = vmatprep.subr.mxu1 %v1423_v3 }
  0x2e   :  { %1113 = vmatpush3.msra.mxu0 %v1496_v12  ;;  %1146 = vmatpush3.msra.mxu1 %v1486_v10 }
  0x2f   :  { %1114 = vmatprep.subr.mxu0 %v1423_v3  ;;  %1147 = vmatprep.subr.mxu1 %v1423_v3 }
  0x30   :  { %1115 = vmatpush3.msra.mxu0 %v1506_v14  ;;  %1148 = vmatpush3.msra.mxu1 %v1496_v12 }
  0x31   :  { %1116 = vmatprep.subr.mxu0 %v1423_v3  ;;  %1149 = vmatprep.subr.mxu1 %v1423_v3 }
  0x32   :  { %1117 = vmatpush3.msra.mxu0 %v1516_v16  ;;  %1150 = vmatpush3.msra.mxu1 %v1506_v14 }
  0x33   :  { %1118 = vmatprep.subr.mxu0 %v1423_v3  ;;  %1151 = vmatprep.subr.mxu1 %v1423_v3 }
  0x34   :  { %1119 = vmatpush3.msra.mxu0 %v1526_v18  ;;  %1152 = vmatpush3.msra.mxu1 %v1516_v16 }
  0x35   :  { %1120 = vmatprep.subr.mxu0 %v1423_v3  ;;  %1153 = vmatprep.subr.mxu1 %v1423_v3 }
  0x36   :  { %1121 = vmatpush3.msra.mxu0 %v1536_v20  ;;  %1154 = vmatpush3.msra.mxu1 %v1526_v18 }
  0x37   :  { %1122 = vmatprep.subr.mxu0 %v1423_v3  ;;  %1155 = vmatprep.subr.mxu1 %v1423_v3 }
  0x38   :  { %1123 = vmatpush3.msra.mxu0 %v1546_v22  ;;  %1156 = vmatpush3.msra.mxu1 %v1536_v20 }
  0x39   :  { %1124 = vmatprep.subr.mxu0 %v1423_v3  ;;  %1157 = vmatprep.subr.mxu1 %v1423_v3 }
  0x3a   :  { %1125 = vmatpush3.msra.mxu0 %v1556_v24  ;;  %1158 = vmatpush3.msra.mxu1 %v1546_v22 }
  0x3b   :  { %1126 = vmatprep.subr.mxu0 %v1423_v3  ;;  %1159 = vmatprep.subr.mxu1 %v1423_v3 }
  0x3c   :  { %1127 = vmatpush3.msra.mxu0 %v1566_v26  ;;  %1160 = vmatpush3.msra.mxu1 %v1556_v24 }
  0x3d   :  { %1128 = vmatprep.subr.mxu0 %v1423_v3  ;;  %1161 = vmatprep.subr.mxu1 %v1423_v3 }
  0x3e   :  { %1129 = vmatpush3.msra.mxu0 %v1576_v28  ;;  %1162 = vmatpush3.msra.mxu1 %v1566_v26 }
  0x3f   :  { %1130 = vmatprep.subr.mxu0 %v1423_v3  ;;  %1163 = vmatprep.subr.mxu1 %v1423_v3 }
  0x40   :  { %1131 = vmatpush3.msra.mxu0 %v1593_v32  ;;  %1164 = vmatpush3.msra.mxu1 %v1576_v28 }
  0x41   :  { %1132 = vmatprep.subr.mxu0 %v1423_v3  ;;  %1165 = vmatprep.subr.mxu1 %v1423_v3 }
  0x42   :  { %1133 = vmatpush3.msra.mxu0 %v1602_v34  ;;  %1166 = vmatpush3.msra.mxu1 %v1593_v32 }
  0x43   :  { %1167 = vmatprep.subr.mxu1 %v1423_v3  ;;  %1169 = vmatprep.mubr.msk.f32.mxu1 %vm1424_vm0, %v1423_v3 }
  0x44   :  { %1168 = vmatpush3.msra.mxu1 %v1602_v34  ;;  %1172 = vmatprep.subr.mxu0 %v1423_v3 }
  0x45   :  { %1207 = vmatprep.subr.mxu1 %v1423_v3  ;;  %1058 = vmatprep.mubr.f32.mxu0 %v64_v35  ;;  %v46_v35 = vld [vmem:[%s1967_s1 + $0x110] sm:$0xff] }
  0x46   :  { %1059 = vmatmul.mubr.f32.gmra.mxu0 %v65_v36  ;;  %v45_v36 = vld [vmem:[%s1967_s1 + $0x108] sm:$0xff] }
  0x47   :  { %1061 = vmatprep.mubr.f32.mxu0 %v66_v37  ;;  %v44_v37 = vld [vmem:[%s1967_s1 + $0x100] sm:$0xff] }
  0x4a   :  { %1062 = vmatmul.mubr.f32.gmra.mxu0 %v67_v38 }
  0x4b   :  { %1064 = vmatprep.mubr.f32.mxu0 %v68_v39 }
  0x4e   :  { %1065 = vmatmul.mubr.f32.gmra.mxu0 %v69_v40 }
  0x4f   :  { %1134 = vmatprep.mubr.msk.f32.mxu0 %vm1424_vm0, %v1423_v3 }
  0xe2   :  { %v1057_v41 = vpop.f32.mrf.mxu0 }
  0xe3   :  { %v146_v55 = vadd.f32 %v1057_v41, %v1701_v42 }
  0xe4   :  { %v140_v43 = vpop.f32.mrf.mxu0  ;;  %v245_v44 = vpop.f32.mrf.mxu1 }
  0xe5   :  { %v141_v45 = vadd.f32 %v1701_v42, %v140_v43 }
  0xe6   :  { %v1101_v46 = vpop.f32.mrf.mxu1 }
  0xe7   :  { %v249_v47 = vadd.f32 %v245_v44, %v141_v45  ;;  %v845_v44 = vld [vmem:[%s1967_s1 + $0x188] ss:$0 sm:$0xff] }
  0xe9   :  { %1385 = vtanh.f32 %v249_v47 }
  0xf6   :  { %v1386_v48 = vpop.eup %1385 }
  0xf7   :  { %1135 = vmatmul.mubr.f32.vlgmr.msra.gmra.mxu0 %v1386_v48 }
  0xf8   :  { %1173 = vmatpush3.msra.mxu0 %v1450_v2  ;;  %1204 = vmatprep.mubr.msk.f32.mxu0 %vm1424_vm0, %v1423_v3 }
  0xf9   :  { %1174 = vmatprep.subr.mxu0 %v1423_v3 }
  0xfa   :  { %1175 = vmatpush3.msra.mxu0 %v1456_v4 }
  0xfb   :  { %1176 = vmatprep.subr.mxu0 %v1423_v3 }
  0xfc   :  { %1177 = vmatpush3.msra.mxu0 %v1466_v6 }
  0xfd   :  { %1178 = vmatprep.subr.mxu0 %v1423_v3 }
  0xfe   :  { %1179 = vmatpush3.msra.mxu0 %v1476_v8 }
  0xff   :  { %1180 = vmatprep.subr.mxu0 %v1423_v3 }
 0x100   :  { %1181 = vmatpush3.msra.mxu0 %v1486_v10 }
 0x101   :  { %1182 = vmatprep.subr.mxu0 %v1423_v3 }
 0x102   :  { %1183 = vmatpush3.msra.mxu0 %v1496_v12 }
 0x103   :  { %1184 = vmatprep.subr.mxu0 %v1423_v3 }
 0x104   :  { %1185 = vmatpush3.msra.mxu0 %v1506_v14 }
 0x105   :  { %1186 = vmatprep.subr.mxu0 %v1423_v3 }
 0x106   :  { %1187 = vmatpush3.msra.mxu0 %v1516_v16  ;;  %v1738_v49 = vpop.f32.mrf.mxu0 }
 0x107   :  { %1188 = vmatprep.subr.mxu0 %v1423_v3  ;;  %v156_v1 = vadd.f32 %v1738_v49, %v1701_v42 }
 0x108   :  { %1189 = vmatpush3.msra.mxu0 %v1526_v18  ;;  %v150_v50 = vpop.f32.mrf.mxu0 }
 0x109   :  { %1190 = vmatprep.subr.mxu0 %v1423_v3  ;;  %v151_v60 = vadd.f32 %v1701_v42, %v150_v50 }
 0x10a   :  { %1191 = vmatpush3.msra.mxu0 %v1536_v20  ;;  %v1740_v51 = vpop.f32.mrf.mxu0 }
 0x10b   :  { %1192 = vmatprep.subr.mxu0 %v1423_v3 }
 0x10c   :  { %1193 = vmatpush3.msra.mxu0 %v1546_v22  ;;  %v1742_v52 = vpop.f32.mrf.mxu0 }
 0x10d   :  { %1194 = vmatprep.subr.mxu0 %v1423_v3  ;;  %v161_v13 = vadd.f32 %v1701_v42, %v1742_v52 }
 0x10e   :  { %1195 = vmatpush3.msra.mxu0 %v1556_v24  ;;  %v1744_v53 = vpop.f32.mrf.mxu0 }
 0x10f   :  { %1196 = vmatprep.subr.mxu0 %v1423_v3  ;;  %v176_v38 = vadd.f32 %v1744_v53, %v1701_v42 }
 0x110   :  { %1197 = vmatpush3.msra.mxu0 %v1566_v26  ;;  %v1746_v54 = vpop.f32.mrf.mxu0 }
 0x111   :  { %1198 = vmatprep.subr.mxu0 %v1423_v3 }
 0x112   :  { %1199 = vmatpush3.msra.mxu0 %v1576_v28 }
 0x113   :  { %1200 = vmatprep.subr.mxu0 %v1423_v3 }
 0x114   :  { %1201 = vmatpush3.msra.mxu0 %v1593_v32 }
 0x115   :  { %1202 = vmatprep.subr.mxu0 %v1423_v3 }
 0x116   :  { %1203 = vmatpush3.msra.mxu0 %v1602_v34 }
 0x117   :  { %1242 = vmatprep.subr.mxu0 %v1423_v3 }
 0x1b7   :  { %v317_v56 = vpop.f32.mrf.mxu0 }
 0x1b8   :  { %v321_v57 = vadd.f32 %v317_v56, %v146_v55 }
 0x1b9   :  { %v1136_v58 = vpop.f32.mrf.mxu0 }
 0x1ba   :  { %1387 = vtanh.f32 %v321_v57 }
 0x1c7   :  { %v1388_v59 = vpop.eup %1387 }
 0x1c8   :  { %1170 = vmatmul.mubr.f32.vlgmr.msra.gmra.mxu1 %v1388_v59 }
 0x1c9   :  { %1208 = vmatpush3.msra.mxu1 %v1450_v2  ;;  %1239 = vmatprep.mubr.msk.f32.mxu1 %vm1424_vm0, %v1423_v3 }
 0x1ca   :  { %1209 = vmatprep.subr.mxu1 %v1423_v3 }
 0x1cb   :  { %1210 = vmatpush3.msra.mxu1 %v1456_v4 }
 0x1cc   :  { %1211 = vmatprep.subr.mxu1 %v1423_v3 }
 0x1cd   :  { %1212 = vmatpush3.msra.mxu1 %v1466_v6 }
 0x1ce   :  { %1213 = vmatprep.subr.mxu1 %v1423_v3 }
 0x1cf   :  { %1214 = vmatpush3.msra.mxu1 %v1476_v8 }
 0x1d0   :  { %1215 = vmatprep.subr.mxu1 %v1423_v3 }
 0x1d1   :  { %1216 = vmatpush3.msra.mxu1 %v1486_v10 }
 0x1d2   :  { %1217 = vmatprep.subr.mxu1 %v1423_v3 }
 0x1d3   :  { %1218 = vmatpush3.msra.mxu1 %v1496_v12 }
 0x1d4   :  { %1219 = vmatprep.subr.mxu1 %v1423_v3 }
 0x1d5   :  { %1220 = vmatpush3.msra.mxu1 %v1506_v14 }
 0x1d6   :  { %1221 = vmatprep.subr.mxu1 %v1423_v3 }
 0x1d7   :  { %1222 = vmatpush3.msra.mxu1 %v1516_v16 }
 0x1d8   :  { %1223 = vmatprep.subr.mxu1 %v1423_v3 }
 0x1d9   :  { %1224 = vmatpush3.msra.mxu1 %v1526_v18 }
 0x1da   :  { %1225 = vmatprep.subr.mxu1 %v1423_v3 }
 0x1db   :  { %1226 = vmatpush3.msra.mxu1 %v1536_v20 }
 0x1dc   :  { %1227 = vmatprep.subr.mxu1 %v1423_v3 }
 0x1dd   :  { %1228 = vmatpush3.msra.mxu1 %v1546_v22 }
 0x1de   :  { %1229 = vmatprep.subr.mxu1 %v1423_v3 }
 0x1df   :  { %1230 = vmatpush3.msra.mxu1 %v1556_v24 }
 0x1e0   :  { %1231 = vmatprep.subr.mxu1 %v1423_v3 }
 0x1e1   :  { %1232 = vmatpush3.msra.mxu1 %v1566_v26 }
 0x1e2   :  { %1233 = vmatprep.subr.mxu1 %v1423_v3 }
 0x1e3   :  { %1234 = vmatpush3.msra.mxu1 %v1576_v28 }
 0x1e4   :  { %1235 = vmatprep.subr.mxu1 %v1423_v3 }
 0x1e5   :  { %1236 = vmatpush3.msra.mxu1 %v1593_v32 }
 0x1e6   :  { %1237 = vmatprep.subr.mxu1 %v1423_v3 }
 0x1e7   :  { %1238 = vmatpush3.msra.mxu1 %v1602_v34 }
 0x1e8   :  { %1277 = vmatprep.subr.mxu1 %v1423_v3 }
 0x288   :  { %v389_v61 = vpop.f32.mrf.mxu1 }
 0x289   :  { %v393_v62 = vadd.f32 %v389_v61, %v151_v60 }
 0x28a   :  { %v1171_v63 = vpop.f32.mrf.mxu1 }
 0x28b   :  { %1389 = vtanh.f32 %v393_v62 }
 0x298   :  { %v1390_v0 = vpop.eup %1389 }
 0x299   :  { %1205 = vmatmul.mubr.f32.vlgmr.msra.gmra.mxu0 %v1390_v0 }
 0x29a   :  { %1243 = vmatpush3.msra.mxu0 %v1450_v2  ;;  %1274 = vmatprep.mubr.msk.f32.mxu0 %vm1424_vm0, %v1423_v3 }
 0x29b   :  { %1244 = vmatprep.subr.mxu0 %v1423_v3 }
 0x29c   :  { %1245 = vmatpush3.msra.mxu0 %v1456_v4 }
 0x29d   :  { %1246 = vmatprep.subr.mxu0 %v1423_v3 }
 0x29e   :  { %1247 = vmatpush3.msra.mxu0 %v1466_v6 }
 0x29f   :  { %1248 = vmatprep.subr.mxu0 %v1423_v3 }
 0x2a0   :  { %1249 = vmatpush3.msra.mxu0 %v1476_v8 }
 0x2a1   :  { %1250 = vmatprep.subr.mxu0 %v1423_v3 }
 0x2a2   :  { %1251 = vmatpush3.msra.mxu0 %v1486_v10 }
 0x2a3   :  { %1252 = vmatprep.subr.mxu0 %v1423_v3 }
 0x2a4   :  { %1253 = vmatpush3.msra.mxu0 %v1496_v12 }
 0x2a5   :  { %1254 = vmatprep.subr.mxu0 %v1423_v3 }
 0x2a6   :  { %1255 = vmatpush3.msra.mxu0 %v1506_v14 }
 0x2a7   :  { %1256 = vmatprep.subr.mxu0 %v1423_v3 }
 0x2a8   :  { %1257 = vmatpush3.msra.mxu0 %v1516_v16 }
 0x2a9   :  { %1258 = vmatprep.subr.mxu0 %v1423_v3 }
 0x2aa   :  { %1259 = vmatpush3.msra.mxu0 %v1526_v18 }
 0x2ab   :  { %1260 = vmatprep.subr.mxu0 %v1423_v3 }
 0x2ac   :  { %1261 = vmatpush3.msra.mxu0 %v1536_v20 }
 0x2ad   :  { %1262 = vmatprep.subr.mxu0 %v1423_v3 }
 0x2ae   :  { %1263 = vmatpush3.msra.mxu0 %v1546_v22 }
 0x2af   :  { %1264 = vmatprep.subr.mxu0 %v1423_v3 }
 0x2b0   :  { %1265 = vmatpush3.msra.mxu0 %v1556_v24 }
 0x2b1   :  { %1266 = vmatprep.subr.mxu0 %v1423_v3 }
 0x2b2   :  { %1267 = vmatpush3.msra.mxu0 %v1566_v26 }
 0x2b3   :  { %1268 = vmatprep.subr.mxu0 %v1423_v3 }
 0x2b4   :  { %1269 = vmatpush3.msra.mxu0 %v1576_v28 }
 0x2b5   :  { %1270 = vmatprep.subr.mxu0 %v1423_v3 }
 0x2b6   :  { %1271 = vmatpush3.msra.mxu0 %v1593_v32 }
 0x2b7   :  { %1272 = vmatprep.subr.mxu0 %v1423_v3 }
 0x2b8   :  { %1273 = vmatpush3.msra.mxu0 %v1602_v34 }
 0x2b9   :  { %1312 = vmatprep.subr.mxu0 %v1423_v3 }
 0x359   :  { %v461_v5 = vpop.f32.mrf.mxu0 }
 0x35a   :  { %v465_v7 = vadd.f32 %v461_v5, %v156_v1 }
 0x35b   :  { %v1206_v9 = vpop.f32.mrf.mxu0 }
 0x35c   :  { %1391 = vtanh.f32 %v465_v7 }
 0x369   :  { %v1392_v11 = vpop.eup %1391 }
 0x36a   :  { %1240 = vmatmul.mubr.f32.vlgmr.msra.gmra.mxu1 %v1392_v11 }
 0x36b   :  { %1278 = vmatpush3.msra.mxu1 %v1450_v2  ;;  %1309 = vmatprep.mubr.msk.f32.mxu1 %vm1424_vm0, %v1423_v3 }
 0x36c   :  { %1279 = vmatprep.subr.mxu1 %v1423_v3 }
 0x36d   :  { %1280 = vmatpush3.msra.mxu1 %v1456_v4 }
 0x36e   :  { %1281 = vmatprep.subr.mxu1 %v1423_v3 }
 0x36f   :  { %1282 = vmatpush3.msra.mxu1 %v1466_v6 }
 0x370   :  { %1283 = vmatprep.subr.mxu1 %v1423_v3 }
 0x371   :  { %1284 = vmatpush3.msra.mxu1 %v1476_v8 }
 0x372   :  { %1285 = vmatprep.subr.mxu1 %v1423_v3 }
 0x373   :  { %1286 = vmatpush3.msra.mxu1 %v1486_v10 }
 0x374   :  { %1287 = vmatprep.subr.mxu1 %v1423_v3 }
 0x375   :  { %1288 = vmatpush3.msra.mxu1 %v1496_v12 }
 0x376   :  { %1289 = vmatprep.subr.mxu1 %v1423_v3 }
 0x377   :  { %1290 = vmatpush3.msra.mxu1 %v1506_v14 }
 0x378   :  { %1291 = vmatprep.subr.mxu1 %v1423_v3 }
 0x379   :  { %1292 = vmatpush3.msra.mxu1 %v1516_v16 }
 0x37a   :  { %1293 = vmatprep.subr.mxu1 %v1423_v3 }
 0x37b   :  { %1294 = vmatpush3.msra.mxu1 %v1526_v18 }
 0x37c   :  { %1295 = vmatprep.subr.mxu1 %v1423_v3 }
 0x37d   :  { %1296 = vmatpush3.msra.mxu1 %v1536_v20 }
 0x37e   :  { %1297 = vmatprep.subr.mxu1 %v1423_v3 }
 0x37f   :  { %1298 = vmatpush3.msra.mxu1 %v1546_v22 }
 0x380   :  { %1299 = vmatprep.subr.mxu1 %v1423_v3 }
 0x381   :  { %1300 = vmatpush3.msra.mxu1 %v1556_v24 }
 0x382   :  { %1301 = vmatprep.subr.mxu1 %v1423_v3 }
 0x383   :  { %1302 = vmatpush3.msra.mxu1 %v1566_v26 }
 0x384   :  { %1303 = vmatprep.subr.mxu1 %v1423_v3 }
 0x385   :  { %1304 = vmatpush3.msra.mxu1 %v1576_v28 }
 0x386   :  { %1305 = vmatprep.subr.mxu1 %v1423_v3 }
 0x387   :  { %1306 = vmatpush3.msra.mxu1 %v1593_v32 }
 0x388   :  { %1307 = vmatprep.subr.mxu1 %v1423_v3 }
 0x389   :  { %1308 = vmatpush3.msra.mxu1 %v1602_v34 }
 0x38a   :  { %1347 = vmatprep.subr.mxu1 %v1423_v3 }
 0x42a   :  { %v533_v15 = vpop.f32.mrf.mxu1 }
 0x42b   :  { %v537_v17 = vadd.f32 %v533_v15, %v161_v13 }
 0x42c   :  { %v1241_v19 = vpop.f32.mrf.mxu1 }
 0x42d   :  { %1393 = vtanh.f32 %v537_v17 }
 0x43a   :  { %v1394_v21 = vpop.eup %1393 }
 0x43b   :  { %1275 = vmatmul.mubr.f32.vlgmr.msra.gmra.mxu0 %v1394_v21 }
 0x43c   :  { %1313 = vmatpush3.msra.mxu0 %v1450_v2  ;;  %1344 = vmatprep.mubr.msk.f32.mxu0 %vm1424_vm0, %v1423_v3  ;;  %v166_v2 = vadd.f32 %v1740_v51, %v1701_v42 }
 0x43d   :  { %1314 = vmatprep.subr.mxu0 %v1423_v3 }
 0x43e   :  { %1315 = vmatpush3.msra.mxu0 %v1456_v4 }
 0x43f   :  { %1316 = vmatprep.subr.mxu0 %v1423_v3 }
 0x440   :  { %1317 = vmatpush3.msra.mxu0 %v1466_v6 }
 0x441   :  { %1318 = vmatprep.subr.mxu0 %v1423_v3 }
 0x442   :  { %1319 = vmatpush3.msra.mxu0 %v1476_v8 }
 0x443   :  { %1320 = vmatprep.subr.mxu0 %v1423_v3 }
 0x444   :  { %1321 = vmatpush3.msra.mxu0 %v1486_v10 }
 0x445   :  { %1322 = vmatprep.subr.mxu0 %v1423_v3 }
 0x446   :  { %1323 = vmatpush3.msra.mxu0 %v1496_v12  ;;  %v59_v12 = vld [vmem:[%s1967_s1 + $0x178] sm:$0xff] }
 0x447   :  { %1324 = vmatprep.subr.mxu0 %v1423_v3 }
 0x448   :  { %1325 = vmatpush3.msra.mxu0 %v1506_v14  ;;  %v58_v14 = vld [vmem:[%s1967_s1 + $0x170] sm:$0xff] }
 0x449   :  { %1326 = vmatprep.subr.mxu0 %v1423_v3 }
 0x44a   :  { %1327 = vmatpush3.msra.mxu0 %v1516_v16  ;;  %v57_v16 = vld [vmem:[%s1967_s1 + $0x168] sm:$0xff] }
 0x44b   :  { %1328 = vmatprep.subr.mxu0 %v1423_v3 }
 0x44c   :  { %1329 = vmatpush3.msra.mxu0 %v1526_v18  ;;  %v56_v18 = vld [vmem:[%s1967_s1 + $0x160] sm:$0xff] }
 0x44d   :  { %1330 = vmatprep.subr.mxu0 %v1423_v3 }
 0x44e   :  { %1331 = vmatpush3.msra.mxu0 %v1536_v20  ;;  %v55_v20 = vld [vmem:[%s1967_s1 + $0x158] sm:$0xff] }
 0x44f   :  { %1332 = vmatprep.subr.mxu0 %v1423_v3 }
 0x450   :  { %1333 = vmatpush3.msra.mxu0 %v1546_v22  ;;  %v54_v22 = vld [vmem:[%s1967_s1 + $0x150] sm:$0xff] }
 0x451   :  { %1334 = vmatprep.subr.mxu0 %v1423_v3 }
 0x452   :  { %1335 = vmatpush3.msra.mxu0 %v1556_v24  ;;  %v171_v24 = vadd.f32 %v1701_v42, %v1746_v54 }
 0x453   :  { %1336 = vmatprep.subr.mxu0 %v1423_v3 }
 0x454   :  { %1337 = vmatpush3.msra.mxu0 %v1566_v26 }
 0x455   :  { %1338 = vmatprep.subr.mxu0 %v1423_v3 }
 0x456   :  { %1339 = vmatpush3.msra.mxu0 %v1576_v28 }
 0x457   :  { %1340 = vmatprep.subr.mxu0 %v1423_v3 }
 0x458   :  { %1341 = vmatpush3.msra.mxu0 %v1593_v32  ;;  %v49_v32 = vld [vmem:[%s1967_s1 + $0x128] sm:$0xff] }
 0x459   :  { %1342 = vmatprep.subr.mxu0 %v1423_v3 }
 0x45a   :  { %1343 = vmatpush3.msra.mxu0 %v1602_v34  ;;  %v47_v34 = vld [vmem:[%s1967_s1 + $0x118] sm:$0xff] }
 0x4fb   :  { %v605_v4 = vpop.f32.mrf.mxu0 }
 0x4fc   :  { %v609_v6 = vadd.f32 %v605_v4, %v166_v2 }
 0x4fd   :  { %v1276_v8 = vpop.f32.mrf.mxu0 }
 0x4fe   :  { %1395 = vtanh.f32 %v609_v6 }
 0x50b   :  { %v1396_v10 = vpop.eup %1395 }
 0x50c   :  { %1310 = vmatmul.mubr.f32.vlgmr.msra.gmra.mxu1 %v1396_v10 }
 0x50d   :  { %1379 = vmatprep.mubr.msk.f32.mxu1 %vm1424_vm0, %v1423_v3  ;;  %1348 = vmatpush3.msra.mxu1 %v59_v12 }
 0x50e   :  { %1349 = vmatprep.subr.mxu1 %v1423_v3 }
 0x50f   :  { %1350 = vmatpush3.msra.mxu1 %v58_v14 }
 0x510   :  { %1351 = vmatprep.subr.mxu1 %v1423_v3 }
 0x511   :  { %1352 = vmatpush3.msra.mxu1 %v57_v16 }
 0x512   :  { %1353 = vmatprep.subr.mxu1 %v1423_v3 }
 0x513   :  { %1354 = vmatpush3.msra.mxu1 %v56_v18 }
 0x514   :  { %1355 = vmatprep.subr.mxu1 %v1423_v3 }
 0x515   :  { %1356 = vmatpush3.msra.mxu1 %v55_v20 }
 0x516   :  { %1357 = vmatprep.subr.mxu1 %v1423_v3 }
 0x517   :  { %1358 = vmatpush3.msra.mxu1 %v54_v22 }
 0x518   :  { %1359 = vmatprep.subr.mxu1 %v1423_v3 }
 0x519   :  { %1360 = vmatpush3.msra.mxu1 %v53_v23 }
 0x51a   :  { %1361 = vmatprep.subr.mxu1 %v1423_v3 }
 0x51b   :  { %1362 = vmatpush3.msra.mxu1 %v52_v29 }
 0x51c   :  { %1363 = vmatprep.subr.mxu1 %v1423_v3 }
 0x51d   :  { %1364 = vmatpush3.msra.mxu1 %v51_v30 }
 0x51e   :  { %1365 = vmatprep.subr.mxu1 %v1423_v3 }
 0x51f   :  { %1366 = vmatpush3.msra.mxu1 %v50_v31 }
 0x520   :  { %1367 = vmatprep.subr.mxu1 %v1423_v3 }
 0x521   :  { %1368 = vmatpush3.msra.mxu1 %v49_v32 }
 0x522   :  { %1369 = vmatprep.subr.mxu1 %v1423_v3 }
 0x523   :  { %1370 = vmatpush3.msra.mxu1 %v48_v33 }
 0x524   :  { %1371 = vmatprep.subr.mxu1 %v1423_v3 }
 0x525   :  { %1372 = vmatpush3.msra.mxu1 %v47_v34 }
 0x526   :  { %1373 = vmatprep.subr.mxu1 %v1423_v3 }
 0x527   :  { %1374 = vmatpush3.msra.mxu1 %v46_v35 }
 0x528   :  { %1375 = vmatprep.subr.mxu1 %v1423_v3 }
 0x529   :  { %1376 = vmatpush3.msra.mxu1 %v45_v36 }
 0x52a   :  { %1377 = vmatprep.subr.mxu1 %v1423_v3 }
 0x52b   :  { %1378 = vmatpush3.msra.mxu1 %v44_v37 }
 0x5cc   :  { %v677_v25 = vpop.f32.mrf.mxu1 }
 0x5cd   :  { %v681_v26 = vadd.f32 %v677_v25, %v171_v24 }
 0x5ce   :  { %v1311_v27 = vpop.f32.mrf.mxu1 }
 0x5cf   :  { %1397 = vtanh.f32 %v681_v26 }
 0x5dc   :  { %v1398_v28 = vpop.eup %1397 }
 0x5dd   :  { %1345 = vmatmul.mubr.f32.vlgmr.msra.gmra.mxu0 %v1398_v28 }
 0x69d   :  { %v749_v39 = vpop.f32.mrf.mxu0 }
 0x69e   :  { %v753_v40 = vadd.f32 %v749_v39, %v176_v38 }
 0x69f   :  { %v1346_v41 = vpop.f32.mrf.mxu0 }
 0x6a0   :  { %1399 = vtanh.f32 %v753_v40 }
 0x6ad   :  { %v1400_v43 = vpop.eup %1399 }
 0x6ae   :  { %1380 = vmatmul.mubr.f32.vlgmr.msra.gmra.mxu1 %v1400_v43 }
 0x76e   :  { %v825_v45 = vpop.f32.mrf.mxu1 }
 0x76f   :  { %v826_v46 = vadd.f32 %v845_v44, %v825_v45 }
 0x770   :  { %v1381_v3 = vpop.f32.mrf.mxu1 }
 0x771   :  { %829 = vst [vmem:[#allocation2] sm:$0xff] %v826_v46 }
 0x772   :  { %1412 = shalt.err (!%p1409_p4)
}
 0x773   :  { %839 = dma.vmem_to_hbm [thread:$0]  %s837_s12, 128, %s1968_s2, [#allocation3]  }
 0x774   :  { %1421 = dma.done.wait [#allocation3], 128  }
 0x775   :  { %1422 = vsyncadd [#allocation3], 4294967168 }
 0x776   :  { %843 = vsyncpa [#allocation3], 1 }

</bundles_post_ra>
